<compile_context>
chip_gen: v7x
topology: tpu7x:2x2x1
jax: 0.10.0
libtpu: 0.0.40
codegen_flags: <defaults>
</compile_context>

<pallas_src>
import functools

import jax
import jax.numpy as jnp
from jax.experimental import pallas as pl
from jax.experimental.pallas import tpu as pltpu

LN_EPS = 1e-5  # torch.nn.LayerNorm default


def _round_up(n, m):
    return ((n + m - 1) // m) * m


def prenorm_kernel(x_ref, gamma_ref, beta_ref, w_ref, b_ref, o_ref,
                   *, d_real, bf16_mxu):
    # x_ref: (TR, Dp) row tile; gamma/beta/bias: (1, Dp); w_ref: (Dp, Dp) = W^T
    x = x_ref[...].astype(jnp.float32)
    tr, dp = x.shape

    # Hoisted parameter reads / broadcasts (read once, reuse).
    gamma = gamma_ref[...].astype(jnp.float32)
    beta = beta_ref[...].astype(jnp.float32)
    bias = b_ref[...].astype(jnp.float32)

    inv_d = jnp.float32(1.0 / d_real)

    # LayerNorm over the real feature lanes only.  Padded lanes of x are zero,
    # so a plain sum / d_real gives the correct mean.
    mean = jnp.sum(x, axis=-1, keepdims=True) * inv_d
    xc = x - mean
    if dp != d_real:
        lane = jax.lax.broadcasted_iota(jnp.int32, (tr, dp), dimension=1)
        xc_m = jnp.where(lane < d_real, xc, 0.0)
    else:
        xc_m = xc
    var = jnp.sum(xc_m * xc_m, axis=-1, keepdims=True) * inv_d  # biased, like torch
    inv = jax.lax.rsqrt(var + LN_EPS)
    # gamma/beta are zero on padded lanes -> normed is exactly 0 there.
    normed = xc * inv * gamma + beta

    # fn = Linear(D, D): y = normed @ W^T + b (w_ref already holds W^T, and is
    # already bf16 when bf16_mxu=True -- no per-step weight cast).
    if bf16_mxu:
        lhs = normed.astype(jnp.bfloat16)
    else:
        lhs = normed
    y = jnp.dot(lhs, w_ref[...], preferred_element_type=jnp.float32)
    y = y + bias

    o_ref[...] = y.astype(o_ref.dtype)


@functools.partial(jax.jit, static_argnames=("tile_rows", "bf16_mxu"))
def prenorm_forward(x, gamma, beta, w_t, b, *, tile_rows=256, bf16_mxu=True):
    B, S, D = x.shape
    N = B * S

    # Lane-dense feature dim (multiple of 128).
    Dp = _round_up(D, 128)

    # Row tile: multiple of 8, no larger than the (8-rounded) row count.
    tr = _round_up(max(8, min(tile_rows, _round_up(N, 8))), 8)
    Np = _round_up(N, tr)
    grid = (Np // tr,)

    pad_d = Dp - D

    x2 = x.reshape(N, D)
    if Np != N or pad_d:
        x2 = jnp.pad(x2, ((0, Np - N), (0, pad_d)))

    def _pad_row(v):
        v = v.reshape(1, D)
        return jnp.pad(v, ((0, 0), (0, pad_d))) if pad_d else v

    gamma2 = _pad_row(gamma)
    beta2 = _pad_row(beta)
    bias2 = _pad_row(b)

    w2 = jnp.pad(w_t, ((0, pad_d), (0, pad_d))) if pad_d else w_t
    if bf16_mxu:
        w2 = w2.astype(jnp.bfloat16)   # cast once; kernel uses it directly

    itemsize_x = jnp.dtype(x.dtype).itemsize
    itemsize_w = jnp.dtype(w2.dtype).itemsize

    # VMEM budget (double-buffered x/out tiles + resident W^T x2 + params).
    vmem_need = (2 * tr * Dp * itemsize_x            # x tiles
                 + 2 * tr * Dp * itemsize_x          # out tiles
                 + 2 * Dp * Dp * itemsize_w          # W^T (resident, x2 buffers)
                 + 6 * Dp * 4)                       # gamma/beta/bias
    cp_kwargs = dict(dimension_semantics=("parallel",))
    if vmem_need > 24 * 1024 * 1024:
        cp_kwargs["vmem_limit_bytes"] = min(int(vmem_need * 3 // 2),
                                            100 * 1024 * 1024)

    cost = pl.CostEstimate(
        flops=2 * Np * Dp * Dp,
        transcendentals=0,
        bytes_accessed=(2 * Np * Dp * itemsize_x
                        + Dp * Dp * itemsize_w
                        + 3 * Dp * 4),
    )

    kernel = functools.partial(prenorm_kernel, d_real=D, bf16_mxu=bf16_mxu)

    out2 = pl.pallas_call(
        kernel,
        out_shape=jax.ShapeDtypeStruct((Np, Dp), x.dtype),
        grid_spec=pltpu.PrefetchScalarGridSpec(
            num_scalar_prefetch=0,
            grid=grid,
            in_specs=[
                pl.BlockSpec((tr, Dp), lambda i: (i, 0)),   # x rows tile
                pl.BlockSpec((1, Dp), lambda i: (0, 0)),    # gamma (resident)
                pl.BlockSpec((1, Dp), lambda i: (0, 0)),    # beta  (resident)
                pl.BlockSpec((Dp, Dp), lambda i: (0, 0)),   # W^T   (resident)
                pl.BlockSpec((1, Dp), lambda i: (0, 0)),    # bias  (resident)
            ],
            out_specs=pl.BlockSpec((tr, Dp), lambda i: (i, 0)),
        ),
        compiler_params=pltpu.CompilerParams(**cp_kwargs),
        cost_estimate=cost,
    )(x2, gamma2, beta2, w2, bias2)

    return out2[:N, :D].reshape(B, S, D)


def reference_forward(x, gamma, beta, w_t, b):
    xf = x.astype(jnp.float32)
    mean = jnp.mean(xf, axis=-1, keepdims=True)
    var = jnp.mean((xf - mean) ** 2, axis=-1, keepdims=True)
    normed = (xf - mean) * jax.lax.rsqrt(var + LN_EPS) * gamma + beta
    return (normed @ w_t + b).astype(x.dtype)


if __name__ == "__main__":
    B, S, D = 2, 8, 32

    key = jax.random.PRNGKey(0)
    kx, kw, kb = jax.random.split(key, 3)

    x = jax.random.normal(kx, (B, S, D), dtype=jnp.float32)

    # Deterministic parameter init (synthetic, not a checkpoint).
    gamma = jnp.ones((D,), dtype=jnp.float32)   # nn.LayerNorm weight init
    beta = jnp.zeros((D,), dtype=jnp.float32)   # nn.LayerNorm bias init
    w = jax.random.normal(kw, (D, D), dtype=jnp.float32) * (1.0 / jnp.sqrt(D))
    bias = jax.random.normal(kb, (D,), dtype=jnp.float32) * 0.01
    w_t = w.T  # kernel consumes W^T so y = normed @ W^T + b matches nn.Linear

    ref = reference_forward(x, gamma, beta, w_t, bias)

    # Default (perf) path: bf16 MXU inputs, f32 accumulate -> looser tolerance.
    out = prenorm_forward(x, gamma, beta, w_t, bias)
    out = jax.block_until_ready(out)
    assert out.shape == (B, S, D)
    assert jnp.allclose(out, ref, atol=5e-2, rtol=5e-2), "bf16-MXU path mismatch"

    # Full-f32 path: tight tolerance against the reference.
    out_f32 = prenorm_forward(x, gamma, beta, w_t, bias, bf16_mxu=False)
    out_f32 = jax.block_until_ready(out_f32)
    assert jnp.allclose(out_f32, ref, atol=1e-4, rtol=1e-4), "f32 path mismatch"

    print("KERNEL_OK")
</pallas_src>

<mosaic_0001>
module attributes {stable_mosaic.version = 11 : i64} {
  func.func @prenorm_kernel(%arg0: i32, %arg1: memref<16x128xf32, #tpu.memory_space<vmem>>, %arg2: memref<1x128xf32, #tpu.memory_space<vmem>>, %arg3: memref<1x128xf32, #tpu.memory_space<vmem>>, %arg4: memref<128x128xbf16, #tpu.memory_space<vmem>>, %arg5: memref<1x128xf32, #tpu.memory_space<vmem>>, %arg6: memref<16x128xf32, #tpu.memory_space<vmem>>) attributes {dimension_semantics = [#tpu.dimension_semantics<parallel>], iteration_bounds = array<i64: 1>, scalar_prefetch = 0 : i64, scratch_operands = 0 : i64, tpu.core_type = #tpu.core_type<tc>, window_params = [{transform_indices = @transform_0, window_bounds = array<i64: 16, 128>}, {pipeline_mode = #tpu.pipeline_mode<synchronous>, transform_indices = @transform_1, window_bounds = array<i64: 1, 128>}, {pipeline_mode = #tpu.pipeline_mode<synchronous>, transform_indices = @transform_2, window_bounds = array<i64: 1, 128>}, {pipeline_mode = #tpu.pipeline_mode<synchronous>, transform_indices = @transform_3, window_bounds = array<i64: 128, 128>}, {pipeline_mode = #tpu.pipeline_mode<synchronous>, transform_indices = @transform_4, window_bounds = array<i64: 1, 128>}, {transform_indices = @transform_5, window_bounds = array<i64: 16, 128>}]} {
    %c0 = arith.constant 0 : index
    %c0_0 = arith.constant 0 : index
    %0 = vector.load %arg1[%c0, %c0_0] : memref<16x128xf32, #tpu.memory_space<vmem>>, vector<16x128xf32>
    %c0_1 = arith.constant 0 : index
    %c0_2 = arith.constant 0 : index
    %1 = vector.load %arg2[%c0_1, %c0_2] : memref<1x128xf32, #tpu.memory_space<vmem>>, vector<1x128xf32>
    %c0_3 = arith.constant 0 : index
    %c0_4 = arith.constant 0 : index
    %2 = vector.load %arg3[%c0_3, %c0_4] : memref<1x128xf32, #tpu.memory_space<vmem>>, vector<1x128xf32>
    %c0_5 = arith.constant 0 : index
    %c0_6 = arith.constant 0 : index
    %3 = vector.load %arg5[%c0_5, %c0_6] : memref<1x128xf32, #tpu.memory_space<vmem>>, vector<1x128xf32>
    %cst = arith.constant dense<0.000000e+00> : vector<16xf32>
    %4 = vector.multi_reduction <add>, %0, %cst [1] : vector<16x128xf32> to vector<16xf32>
    %5 = vector.shape_cast %4 : vector<16xf32> to vector<16x1xf32>
    %cst_7 = arith.constant 3.125000e-02 : f32
    %6 = vector.broadcast %cst_7 : f32 to vector<16x1xf32>
    %7 = arith.mulf %5, %6 : vector<16x1xf32>
    %8 = vector.broadcast %7 : vector<16x1xf32> to vector<16x128xf32>
    %9 = arith.subf %0, %8 : vector<16x128xf32>
    %10 = tpu.iota {dimensions = array<i32: 1>} : vector<16x128xi32>
    %c32_i32 = arith.constant 32 : i32
    %11 = vector.broadcast %c32_i32 : i32 to vector<16x128xi32>
    %12 = arith.cmpi slt, %10, %11 : vector<16x128xi32>
    %cst_8 = arith.constant 0.000000e+00 : f32
    %13 = vector.broadcast %cst_8 : f32 to vector<16x128xf32>
    %14 = arith.select %12, %9, %13 : vector<16x128xi1>, vector<16x128xf32>
    %15 = arith.mulf %14, %14 : vector<16x128xf32>
    %cst_9 = arith.constant dense<0.000000e+00> : vector<16xf32>
    %16 = vector.multi_reduction <add>, %15, %cst_9 [1] : vector<16x128xf32> to vector<16xf32>
    %17 = vector.shape_cast %16 : vector<16xf32> to vector<16x1xf32>
    %cst_10 = arith.constant 3.125000e-02 : f32
    %18 = vector.broadcast %cst_10 : f32 to vector<16x1xf32>
    %19 = arith.mulf %17, %18 : vector<16x1xf32>
    %cst_11 = arith.constant 9.99999974E-6 : f32
    %20 = vector.broadcast %cst_11 : f32 to vector<16x1xf32>
    %21 = arith.addf %19, %20 : vector<16x1xf32>
    %22 = math.rsqrt %21 : vector<16x1xf32>
    %23 = vector.broadcast %22 : vector<16x1xf32> to vector<16x128xf32>
    %24 = arith.mulf %9, %23 : vector<16x128xf32>
    %25 = vector.broadcast %1 : vector<1x128xf32> to vector<16x128xf32>
    %26 = arith.mulf %24, %25 : vector<16x128xf32>
    %27 = vector.broadcast %2 : vector<1x128xf32> to vector<16x128xf32>
    %28 = arith.addf %26, %27 : vector<16x128xf32>
    %29 = arith.truncf %28 : vector<16x128xf32> to vector<16x128xbf16>
    %c0_12 = arith.constant 0 : index
    %c0_13 = arith.constant 0 : index
    %30 = vector.load %arg4[%c0_12, %c0_13] : memref<128x128xbf16, #tpu.memory_space<vmem>>, vector<128x128xbf16>
    %cst_14 = arith.constant dense<0.000000e+00> : vector<16x128xf32>
    %31 = tpu.matmul %29, %30, %cst_14 {dimension_numbers = #tpu.dot_dimension_numbers<[1], [0], [0], [1], [0, 0, 1, 1], [], []>} : vector<16x128xbf16>, vector<128x128xbf16>, vector<16x128xf32> -> vector<16x128xf32>
    %32 = vector.broadcast %3 : vector<1x128xf32> to vector<16x128xf32>
    %33 = arith.addf %31, %32 : vector<16x128xf32>
    %c0_15 = arith.constant 0 : index
    %c0_16 = arith.constant 0 : index
    %34 = vector.load %arg6[%c0_15, %c0_16] : memref<16x128xf32, #tpu.memory_space<vmem>>, vector<16x128xf32>
    tpu.vector_store %arg6[%c0_15, %c0_16], %33 {strides = array<i32>} : memref<16x128xf32, #tpu.memory_space<vmem>>, vector<16x128xf32>,
    return
  }
  func.func @transform_0(%arg0: i32) -> (i32, i32) {
    %c0_i32 = arith.constant 0 : i32
    %c0_i32_0 = arith.constant 0 : i32
    return %arg0, %c0_i32 : i32, i32
  }
  func.func @transform_1(%arg0: i32) -> (i32, i32) {
    %c0_i32 = arith.constant 0 : i32
    %c0_i32_0 = arith.constant 0 : i32
    %c0_i32_1 = arith.constant 0 : i32
    return %c0_i32, %c0_i32_0 : i32, i32
  }
  func.func @transform_2(%arg0: i32) -> (i32, i32) {
    %c0_i32 = arith.constant 0 : i32
    %c0_i32_0 = arith.constant 0 : i32
    %c0_i32_1 = arith.constant 0 : i32
    return %c0_i32, %c0_i32_0 : i32, i32
  }
  func.func @transform_3(%arg0: i32) -> (i32, i32) {
    %c0_i32 = arith.constant 0 : i32
    %c0_i32_0 = arith.constant 0 : i32
    %c0_i32_1 = arith.constant 0 : i32
    return %c0_i32, %c0_i32_0 : i32, i32
  }
  func.func @transform_4(%arg0: i32) -> (i32, i32) {
    %c0_i32 = arith.constant 0 : i32
    %c0_i32_0 = arith.constant 0 : i32
    %c0_i32_1 = arith.constant 0 : i32
    return %c0_i32, %c0_i32_0 : i32, i32
  }
  func.func @transform_5(%arg0: i32) -> (i32, i32) {
    %c0_i32 = arith.constant 0 : i32
    %c0_i32_0 = arith.constant 0 : i32
    return %arg0, %c0_i32 : i32, i32
  }
}

</mosaic_0001>

<bundles_post_ra>
// kernel: prenorm_forward.1
= control target key start
LH: loop header
LB: loop body
LE: loop exit
PB: predicated region body
PF: predicated region fallthrough
CT: control target
= control target key end

     0   :  { %v241_v2 = vmov 0.0   ;;  %v34_v4 = vlaneseq  ;;  %vm242_vm1 = vmmov 0   ;;  %s318_s0 = inlined_call_operand.vmem [shape: f32[16,128], index: 0, kind: input, shape index: {}]   ;;  %s319_s3 = inlined_call_operand.vmem [shape: bf16[128,128], index: 3, kind: input, shape index: {}]   ;;  %s320_s1 = inlined_call_operand.vmem [shape: f32[1,128], index: 1, kind: input, shape index: {}]   ;;  %s321_s2 = inlined_call_operand.vmem [shape: f32[1,128], index: 2, kind: input, shape index: {}]   ;;  %s322_s4 = inlined_call_operand.vmem [shape: f32[1,128], index: 4, kind: input, shape index: {}]   ;;  %s323_s5 = inlined_call_operand.vmem [shape: f32[16,128], index: 5, kind: output, shape index: {}]  }
   0x1   :  { %v21_v0 = vld [vmem:[%s318_s0] sm:$0xff]  ;;  %v22_v1 = vld [vmem:[%s318_s0 + $0x8] sm:$0xff]  ;;  %207 = vmatprep.subr.bf16.mxu0 %v241_v2  ;;  %v231_v17 = vld [vmem:[%s319_s3 + $0x10] sm:$0xff]   ;;  %223 = vmatprep.mubr.msk.bf16.mxu0 %vm242_vm1, %v241_v2 }
   0x2   :  { %26 = vadd.xlane.f32.xlu0 %v21_v0  ;;  %v229_v3 = vld [vmem:[%s319_s3] sm:$0xff]   ;;  %v35_v5 = vand.u32 127, %v34_v4  ;;  %v230_v16 = vld [vmem:[%s319_s3 + $0x8] sm:$0xff]   ;;  %v232_v18 = vld [vmem:[%s319_s3 + $0x18] sm:$0xff]  }
   0x3   :  { %208 = vmatpush3.bf16.msra.mxu0 %v229_v3  ;;  %v233_v19 = vld [vmem:[%s319_s3 + $0x20] sm:$0xff]   ;;  %v234_v20 = vld [vmem:[%s319_s3 + $0x28] sm:$0xff]   ;;  %v235_v21 = vld [vmem:[%s319_s3 + $0x30] sm:$0xff]  }
   0x4   :  { %209 = vmatprep.subr.bf16.mxu0 %v241_v2  ;;  %vm36_vm0 = vcmp.lt.s32.totalorder %v35_v5, 32  ;;  %v236_v22 = vld [vmem:[%s319_s3 + $0x38] sm:$0xff]   ;;  %v187_v31 = vld [vmem:[%s320_s1] ss:$0 sm:$0xff] }
   0x5   :  { %v188_v35 = vld [vmem:[%s321_s2] ss:$0 sm:$0xff] }
   0x6   :  { %28 = vadd.xlane.f32.xlu0 %v22_v1  ;;  %v189_v40 = vld [vmem:[%s322_s4] ss:$0 sm:$0xff] }
   0x7   :  { %210 = vmatpush3.bf16.msra.mxu0 %v230_v16 }
   0x8   :  { %211 = vmatprep.subr.bf16.mxu0 %v241_v2 }
   0xb   :  { %212 = vmatpush3.bf16.msra.mxu0 %v231_v17 }
   0xc   :  { %213 = vmatprep.subr.bf16.mxu0 %v241_v2 }
   0xf   :  { %214 = vmatpush3.bf16.msra.mxu0 %v232_v18 }
  0x10   :  { %215 = vmatprep.subr.bf16.mxu0 %v241_v2 }
  0x13   :  { %216 = vmatpush3.bf16.msra.mxu0 %v233_v19 }
  0x14   :  { %217 = vmatprep.subr.bf16.mxu0 %v241_v2 }
  0x17   :  { %218 = vmatpush3.bf16.msra.mxu0 %v234_v20 }
  0x18   :  { %219 = vmatprep.subr.bf16.mxu0 %v241_v2 }
  0x1b   :  { %220 = vmatpush3.bf16.msra.mxu0 %v235_v21 }
  0x1c   :  { %221 = vmatprep.subr.bf16.mxu0 %v241_v2 }
  0x1f   :  { %222 = vmatpush3.bf16.msra.mxu0 %v236_v22 }
  0x8f   :  { %v27_v6 = vpop.xlane.xlu0 %26 }
  0x90   :  { %v30_v7 = vmul.f32 0.03125, %v27_v6 }
  0x92   :  { %v32_v8 = vsub.f32 %v21_v0, %v30_v7 }
  0x93   :  { %v29_v9 = vpop.xlane.xlu0 %28 }
  0x94   :  { %v31_v10 = vmul.f32 0.03125, %v29_v9  ;;  %v37_v11 = vsel %vm36_vm0, %v32_v8, 0.0 }
  0x95   :  { %v39_v12 = vmul.f32 %v37_v11, %v37_v11 }
  0x96   :  { %v33_v13 = vsub.f32 %v22_v1, %v31_v10 }
  0x97   :  { %41 = vadd.xlane.f32.xlu1 %v39_v12 }
  0x98   :  { %v38_v14 = vsel %vm36_vm0, %v33_v13, 0.0 }
  0x99   :  { %v40_v15 = vmul.f32 %v38_v14, %v38_v14 }
  0x9b   :  { %43 = vadd.xlane.f32.xlu1 %v40_v15 }
 0x124   :  { %v42_v23 = vpop.xlane.xlu1 %41 }
 0x125   :  { %v45_v24 = vmul.f32 0.03125, %v42_v23 }
 0x127   :  { %v47_v25 = vadd.f32 1e-05, %v45_v24 }
 0x128   :  { %v44_v26 = vpop.xlane.xlu1 %43 }
 0x129   :  { %237 = vrsqrt.f32 %v47_v25  ;;  %v46_v27 = vmul.f32 0.03125, %v44_v26 }
 0x12b   :  { %v48_v28 = vadd.f32 1e-05, %v46_v27 }
 0x12d   :  { %239 = vrsqrt.f32 %v48_v28 }
 0x133   :  { %v238_v29 = vpop.eup %237 }
 0x134   :  { %v51_v30 = vmul.f32 %v238_v29, %v32_v8 }
 0x136   :  { %v59_v34 = vmul.f32 %v187_v31, %v51_v30 }
 0x137   :  { %v240_v32 = vpop.eup %239 }
 0x138   :  { %v52_v33 = vmul.f32 %v240_v32, %v33_v13  ;;  %v67_v37 = vadd.f32 %v188_v35, %v59_v34 }
 0x13a   :  { %v60_v36 = vmul.f32 %v187_v31, %v52_v33 }
 0x13c   :  { %v68_v38 = vadd.f32 %v188_v35, %v60_v36 }
 0x13e   :  { %v69_v39 = vpack.c.bf16 %v68_v38, %v67_v37 }
 0x140   :  { %224 = vmatmul.mubr.bf16.vlgmr.msra.gmra.mrb[0].mxu0 %v69_v39 }
 0x213   :  { %v174_v41 = vpop.f32.mrb[0].mxu0 }
 0x214   :  { %v175_v42 = vadd.f32 %v189_v40, %v174_v41  ;;  %v225_v43 = vpop.f32.mrb[1].mxu0 }
 0x215   :  { %v177_v44 = vpop.f32.mrb[2].mxu0 }
 0x216   :  { %181 = vst [vmem:[%s323_s5] sm:$0xff] %v175_v42  ;;  %v178_v45 = vadd.f32 %v189_v40, %v177_v44  ;;  %v226_v46 = vpop.f32.mrb[3].mxu0 }
 0x218   :  { %182 = vst [vmem:[%s323_s5 + $0x8] sm:$0xff] %v178_v45 }

</bundles_post_ra>
